<compile_context>
chip_gen: v6e
topology: v6e:2x2x1
jax: 0.10.0
libtpu: 0.0.40
codegen_flags: <defaults>
</compile_context>

<pallas_src>
import math

import jax
import jax.numpy as jnp
from jax.experimental import pallas as pl
from jax.experimental.pallas import tpu as pltpu

LANE = 128


def _round_up(x, m):
    return (x + m - 1) // m * m


def _critic_kernel(x_ref, w1_ref, b1_ref, w2_ref, b2_ref, w3_ref, b3_ref, out_ref):
    # x_ref: (TB, n_obs) in the matmul dtype (f32 or bf16); biases/w3 row are f32.
    mm_dt = x_ref.dtype
    x = x_ref[...]
    h = jnp.tanh(jnp.dot(x, w1_ref[...], preferred_element_type=jnp.float32)
                 + b1_ref[...])
    h = jnp.tanh(jnp.dot(h.astype(mm_dt), w2_ref[...],
                         preferred_element_type=jnp.float32)
                 + b2_ref[...])
    # Final 64->1 layer on VPU (+ XLU cross-lane sum) instead of a padded MXU tile.
    v = jnp.sum(h * w3_ref[...], axis=-1, keepdims=True) + b3_ref[...]   # (TB, 1)
    out_ref[...] = v.astype(out_ref.dtype)


def _pick_tile(B, tb_max):
    """Sublane-aligned batch tile; keeps >= 2 grid steps for large batches."""
    if B <= tb_max:
        return _round_up(B, 8)
    n_tiles = pl.cdiv(B, tb_max)          # >= 2 here
    return _round_up(pl.cdiv(B, n_tiles), 8)


def _vmem_limit_bytes(TB, n_obs, hidden, mm_itemsize):
    # Double-buffered x + out blocks (lane-padded), resident weights, and headroom
    # for the f32 intermediates.
    x_bytes = 2 * TB * _round_up(n_obs, LANE) * mm_itemsize
    out_bytes = 2 * TB * LANE * 4
    w_bytes = (_round_up(n_obs, 8) + _round_up(hidden, 8)) * _round_up(hidden, LANE) * mm_itemsize
    w_bytes += 4 * 8 * LANE * 4  # biases / w3 row / b3 (lane-padded)
    h_bytes = 4 * TB * _round_up(hidden, LANE) * 4
    est = x_bytes + out_bytes + w_bytes + h_bytes
    return int(min(max(2 * est, 16 << 20), 32 << 20))


def critic_forward(x, params, *, tb_max=1024, matmul_dtype=jnp.float32):
    """Runs Critic.forward(x). Returns value with shape (B, 1), float32."""
    B, n_obs = x.shape
    hidden = params["w1"].shape[1]

    TB = _pick_tile(B, tb_max)
    grid = pl.cdiv(B, TB)

    mm_dt = jnp.dtype(matmul_dtype)
    xd = x.astype(mm_dt)
    w1 = params["w1"].astype(mm_dt)
    w2 = params["w2"].astype(mm_dt)
    b1 = params["b1"].reshape(1, hidden).astype(jnp.float32)
    b2 = params["b2"].reshape(1, hidden).astype(jnp.float32)
    w3_row = params["w3"].reshape(1, hidden).astype(jnp.float32)   # (hidden,1) -> row
    b3 = params["b3"].reshape(1, 1).astype(jnp.float32)

    resident = lambda shape: pl.BlockSpec(shape, lambda i: (0, 0))

    out = pl.pallas_call(
        _critic_kernel,
        out_shape=jax.ShapeDtypeStruct((B, 1), jnp.float32),
        grid_spec=pltpu.PrefetchScalarGridSpec(
            num_scalar_prefetch=0,
            grid=(grid,),
            in_specs=[
                pl.BlockSpec((TB, n_obs), lambda i: (i, 0)),   # x tile (streamed)
                resident((n_obs, hidden)),                     # w1
                resident((1, hidden)),                         # b1
                resident((hidden, hidden)),                    # w2
                resident((1, hidden)),                         # b2
                resident((1, hidden)),                         # w3 as a single row
                resident((1, 1)),                              # b3 scalar
            ],
            out_specs=pl.BlockSpec((TB, 1), lambda i: (i, 0)),
        ),
        compiler_params=pltpu.CompilerParams(
            dimension_semantics=("parallel",),
            vmem_limit_bytes=_vmem_limit_bytes(TB, n_obs, hidden, mm_dt.itemsize),
        ),
    )(xd, w1, b1, w2, b2, w3_row, b3)
    return out


def _linear_init(key, fan_in, fan_out):
    """nn.Linear default init: U(-1/sqrt(fan_in), 1/sqrt(fan_in)); weight stored (in, out)."""
    kw, kb = jax.random.split(key)
    bound = 1.0 / math.sqrt(fan_in)
    w = jax.random.uniform(kw, (fan_in, fan_out), jnp.float32, -bound, bound)
    b = jax.random.uniform(kb, (1, fan_out), jnp.float32, -bound, bound)
    return w, b


def init_params(key, n_obs, hidden=64):
    keys = jax.random.split(key, 3)
    w1, b1 = _linear_init(keys[0], n_obs, hidden)
    w2, b2 = _linear_init(keys[1], hidden, hidden)
    w3, b3 = _linear_init(keys[2], hidden, 1)
    return {"w1": w1, "b1": b1, "w2": w2, "b2": b2, "w3": w3, "b3": b3}


def _reference(x, p):
    h = jnp.tanh(x @ p["w1"] + p["b1"])
    h = jnp.tanh(h @ p["w2"] + p["b2"])
    return h @ p["w3"] + p["b3"]


if __name__ == "__main__":
    key = jax.random.PRNGKey(0)
    k_params, k_x, k_x2 = jax.random.split(key, 3)

    # Small shapes consistent with the module: batch=8, n_observations=8.
    B, N_OBS = 8, 8
    params = init_params(k_params, N_OBS)
    x = jax.random.normal(k_x, (B, N_OBS), jnp.float32)

    value = critic_forward(x, params)
    jax.block_until_ready(value)
    assert value.shape == (B, 1)
    ref = _reference(x, params)
    assert jnp.allclose(value, ref, atol=1e-5, rtol=1e-5)

    # Multi-tile grid with a partial (masked) last tile and batch not a multiple of 8.
    B2 = 300
    x2 = jax.random.normal(k_x2, (B2, N_OBS), jnp.float32)
    value2 = critic_forward(x2, params, tb_max=64)
    jax.block_until_ready(value2)
    assert value2.shape == (B2, 1)
    assert jnp.allclose(value2, _reference(x2, params), atol=1e-5, rtol=1e-5)

    # bf16 MXU-operand path (v6e/v7x traffic cut); relaxed tolerance vs f32 reference.
    value_bf16 = critic_forward(x, params, matmul_dtype=jnp.bfloat16)
    jax.block_until_ready(value_bf16)
    assert jnp.allclose(value_bf16, ref, atol=5e-2, rtol=5e-2)

    print("KERNEL_OK")
</pallas_src>

<mosaic_0001>
module attributes {stable_mosaic.version = 11 : i64} {
  func.func @_critic_kernel(%arg0: i32, %arg1: memref<8x8xf32, #tpu.memory_space<vmem>>, %arg2: memref<8x64xf32, #tpu.memory_space<vmem>>, %arg3: memref<1x64xf32, #tpu.memory_space<vmem>>, %arg4: memref<64x64xf32, #tpu.memory_space<vmem>>, %arg5: memref<1x64xf32, #tpu.memory_space<vmem>>, %arg6: memref<1x64xf32, #tpu.memory_space<vmem>>, %arg7: memref<1x1xf32, #tpu.memory_space<vmem>>, %arg8: memref<8x1xf32, #tpu.memory_space<vmem>>) attributes {dimension_semantics = [#tpu.dimension_semantics<parallel>], iteration_bounds = array<i64: 1>, scalar_prefetch = 0 : i64, scratch_operands = 0 : i64, tpu.core_type = #tpu.core_type<tc>, window_params = [{transform_indices = @transform_0, window_bounds = array<i64: 8, 8>}, {pipeline_mode = #tpu.pipeline_mode<synchronous>, transform_indices = @transform_1, window_bounds = array<i64: 8, 64>}, {pipeline_mode = #tpu.pipeline_mode<synchronous>, transform_indices = @transform_2, window_bounds = array<i64: 1, 64>}, {pipeline_mode = #tpu.pipeline_mode<synchronous>, transform_indices = @transform_3, window_bounds = array<i64: 64, 64>}, {pipeline_mode = #tpu.pipeline_mode<synchronous>, transform_indices = @transform_4, window_bounds = array<i64: 1, 64>}, {pipeline_mode = #tpu.pipeline_mode<synchronous>, transform_indices = @transform_5, window_bounds = array<i64: 1, 64>}, {pipeline_mode = #tpu.pipeline_mode<synchronous>, transform_indices = @transform_6, window_bounds = array<i64: 1, 1>}, {transform_indices = @transform_7, window_bounds = array<i64: 8, 1>}]} {
    %c0 = arith.constant 0 : index
    %c0_0 = arith.constant 0 : index
    %0 = vector.load %arg1[%c0, %c0_0] : memref<8x8xf32, #tpu.memory_space<vmem>>, vector<8x8xf32>
    %c0_1 = arith.constant 0 : index
    %c0_2 = arith.constant 0 : index
    %1 = vector.load %arg2[%c0_1, %c0_2] : memref<8x64xf32, #tpu.memory_space<vmem>>, vector<8x64xf32>
    %cst = arith.constant dense<0.000000e+00> : vector<8x64xf32>
    %2 = tpu.matmul %0, %1, %cst {dimension_numbers = #tpu.dot_dimension_numbers<[1], [0], [0], [1], [0, 0, 1, 1], [], []>} : vector<8x8xf32>, vector<8x64xf32>, vector<8x64xf32> -> vector<8x64xf32>
    %c0_3 = arith.constant 0 : index
    %c0_4 = arith.constant 0 : index
    %3 = vector.load %arg3[%c0_3, %c0_4] : memref<1x64xf32, #tpu.memory_space<vmem>>, vector<1x64xf32>
    %4 = vector.broadcast %3 : vector<1x64xf32> to vector<8x64xf32>
    %5 = arith.addf %2, %4 : vector<8x64xf32>
    %6 = math.tanh %5 : vector<8x64xf32>
    %c0_5 = arith.constant 0 : index
    %c0_6 = arith.constant 0 : index
    %7 = vector.load %arg4[%c0_5, %c0_6] : memref<64x64xf32, #tpu.memory_space<vmem>>, vector<64x64xf32>
    %cst_7 = arith.constant dense<0.000000e+00> : vector<8x64xf32>
    %8 = tpu.matmul %6, %7, %cst_7 {dimension_numbers = #tpu.dot_dimension_numbers<[1], [0], [0], [1], [0, 0, 1, 1], [], []>} : vector<8x64xf32>, vector<64x64xf32>, vector<8x64xf32> -> vector<8x64xf32>
    %c0_8 = arith.constant 0 : index
    %c0_9 = arith.constant 0 : index
    %9 = vector.load %arg5[%c0_8, %c0_9] : memref<1x64xf32, #tpu.memory_space<vmem>>, vector<1x64xf32>
    %10 = vector.broadcast %9 : vector<1x64xf32> to vector<8x64xf32>
    %11 = arith.addf %8, %10 : vector<8x64xf32>
    %12 = math.tanh %11 : vector<8x64xf32>
    %c0_10 = arith.constant 0 : index
    %c0_11 = arith.constant 0 : index
    %13 = vector.load %arg6[%c0_10, %c0_11] : memref<1x64xf32, #tpu.memory_space<vmem>>, vector<1x64xf32>
    %14 = vector.broadcast %13 : vector<1x64xf32> to vector<8x64xf32>
    %15 = arith.mulf %12, %14 : vector<8x64xf32>
    %cst_12 = arith.constant dense<0.000000e+00> : vector<8xf32>
    %16 = vector.multi_reduction <add>, %15, %cst_12 [1] : vector<8x64xf32> to vector<8xf32>
    %17 = vector.shape_cast %16 : vector<8xf32> to vector<8x1xf32>
    %c0_13 = arith.constant 0 : index
    %c0_14 = arith.constant 0 : index
    %18 = vector.load %arg7[%c0_13, %c0_14] : memref<1x1xf32, #tpu.memory_space<vmem>>, vector<1x1xf32>
    %19 = vector.broadcast %18 : vector<1x1xf32> to vector<8x1xf32>
    %20 = arith.addf %17, %19 : vector<8x1xf32>
    %c0_15 = arith.constant 0 : index
    %c0_16 = arith.constant 0 : index
    %21 = vector.load %arg8[%c0_15, %c0_16] : memref<8x1xf32, #tpu.memory_space<vmem>>, vector<8x1xf32>
    tpu.vector_store %arg8[%c0_15, %c0_16], %20 {strides = array<i32>} : memref<8x1xf32, #tpu.memory_space<vmem>>, vector<8x1xf32>,
    return
  }
  func.func @transform_0(%arg0: i32) -> (i32, i32) {
    %c0_i32 = arith.constant 0 : i32
    %c0_i32_0 = arith.constant 0 : i32
    return %arg0, %c0_i32 : i32, i32
  }
  func.func @transform_1(%arg0: i32) -> (i32, i32) {
    %c0_i32 = arith.constant 0 : i32
    %c0_i32_0 = arith.constant 0 : i32
    %c0_i32_1 = arith.constant 0 : i32
    return %c0_i32, %c0_i32_0 : i32, i32
  }
  func.func @transform_2(%arg0: i32) -> (i32, i32) {
    %c0_i32 = arith.constant 0 : i32
    %c0_i32_0 = arith.constant 0 : i32
    %c0_i32_1 = arith.constant 0 : i32
    return %c0_i32, %c0_i32_0 : i32, i32
  }
  func.func @transform_3(%arg0: i32) -> (i32, i32) {
    %c0_i32 = arith.constant 0 : i32
    %c0_i32_0 = arith.constant 0 : i32
    %c0_i32_1 = arith.constant 0 : i32
    return %c0_i32, %c0_i32_0 : i32, i32
  }
  func.func @transform_4(%arg0: i32) -> (i32, i32) {
    %c0_i32 = arith.constant 0 : i32
    %c0_i32_0 = arith.constant 0 : i32
    %c0_i32_1 = arith.constant 0 : i32
    return %c0_i32, %c0_i32_0 : i32, i32
  }
  func.func @transform_5(%arg0: i32) -> (i32, i32) {
    %c0_i32 = arith.constant 0 : i32
    %c0_i32_0 = arith.constant 0 : i32
    %c0_i32_1 = arith.constant 0 : i32
    return %c0_i32, %c0_i32_0 : i32, i32
  }
  func.func @transform_6(%arg0: i32) -> (i32, i32) {
    %c0_i32 = arith.constant 0 : i32
    %c0_i32_0 = arith.constant 0 : i32
    %c0_i32_1 = arith.constant 0 : i32
    return %c0_i32, %c0_i32_0 : i32, i32
  }
  func.func @transform_7(%arg0: i32) -> (i32, i32) {
    %c0_i32 = arith.constant 0 : i32
    %c0_i32_0 = arith.constant 0 : i32
    return %arg0, %c0_i32 : i32, i32
  }
}

</mosaic_0001>

<bundles_post_ra>
// kernel: tpu_custom_call.1
= control target key start
LH: loop header
LB: loop body
LE: loop exit
PB: predicated region body
PF: predicated region fallthrough
CT: control target
= control target key end

     0   :  { %s453_s0 = inlined_call_operand.hbm [shape: f32[8,8], index: 0, kind: input, shape index: {}]   ;;  %s454_s1 = inlined_call_operand.hbm [shape: f32[8,64], index: 1, kind: input, shape index: {}]   ;;  %s455_s2 = inlined_call_operand.vmem [shape: f32[1,64], index: 2, kind: input, shape index: {}]   ;;  %s456_s3 = inlined_call_operand.hbm [shape: f32[64,64], index: 3, kind: input, shape index: {}]   ;;  %s457_s4 = inlined_call_operand.vmem [shape: f32[1,64], index: 4, kind: input, shape index: {}]   ;;  %s458_s5 = inlined_call_operand.vmem [shape: f32[1,64], index: 5, kind: input, shape index: {}]   ;;  %s459_s6 = inlined_call_operand.<no memory space> [shape: f32[1,1], index: 6, kind: input, shape index: {}]   ;;  %s460_s7 = inlined_call_operand.vmem [shape: f32[8,1], index: 7, kind: output, shape index: {}]  }
   0x1   :  { %v12_v0 = vstv %s459_s6 }
   0x2   :  { %13 = vst [vmem:[#allocation2] sm:$0x1] %v12_v0 }
   0x3   :  { %14 = vsyncpa [#allocation4], 0 }
   0x4   :  { %15 = vsyncpa [#allocation6], 0  ;;  %s382_s26 = smov [#allocation5]   ;;  %s383_s28 = smov [#allocation3]  }
   0x5   :  { %s32_s27 = sshll.u32 %s382_s26, 4  ;;  %s22_s29 = sshll.u32 %s383_s28, 4  ;;  %s33_s27 = int_to_ptr.vmem [resolvable:$true] %s32_s27  ;;  %s23_s29 = int_to_ptr.vmem [resolvable:$true] %s22_s29 }
   0x6   :  { %s326_s30 = scalar_lea.vmem %s33_s27, 128  ;;  %p331_p1 = scmp.lt.s32.totalorder %s33_s27, %s33_s27 }
   0x7   :  { %p327_p0 = scmp.ne.s32.totalorder %s33_s27, %s326_s30  ;;  %p332_p2 = scmp.lt.s32.totalorder %s326_s30, %s326_s30 }
   0x9   :  { %p333_p3 = por %p332_p2, %p331_p1 }
   0xb   :  { %p334_p4 = pnand %p333_p3, %p327_p0 }
   0xd   :  { %337 = shalt.err (!%p334_p4)
}
   0xe   :  { %35 = dma.hbm_to_vmem [thread:$0]  %s454_s1, 128, %s33_s27, [#allocation6]  }
   0xf   :  { %s346_s6 = scalar_lea.vmem %s23_s29, 128  ;;  %p351_p6 = scmp.lt.s32.totalorder %s23_s29, %s23_s29 }
  0x10   :  { %p347_p5 = scmp.ne.s32.totalorder %s23_s29, %s346_s6  ;;  %p352_p7 = scmp.lt.s32.totalorder %s346_s6, %s346_s6 }
  0x12   :  { %p353_p8 = por %p352_p7, %p351_p6 }
  0x14   :  { %p354_p9 = pnand %p353_p8, %p347_p5 }
  0x16   :  { %357 = shalt.err (!%p354_p9)
}
  0x17   :  { %25 = dma.hbm_to_vmem [thread:$0]  %s453_s0, 128, %s23_s29, [#allocation4]  }
  0x18   :  { %s384_s12 = smov [#allocation7]  }
  0x19   :  { %s43_s13 = sshll.u32 %s384_s12, 4  ;;  %s44_s13 = int_to_ptr.vmem [resolvable:$true] %s43_s13 }
  0x1a   :  { %s366_s14 = scalar_lea.vmem %s44_s13, 1024  ;;  %p371_p11 = scmp.lt.s32.totalorder %s44_s13, %s44_s13 }
  0x1b   :  { %p367_p10 = scmp.ne.s32.totalorder %s44_s13, %s366_s14  ;;  %p372_p12 = scmp.lt.s32.totalorder %s366_s14, %s366_s14 }
  0x1d   :  { %p373_p13 = por %p372_p12, %p371_p11 }
  0x1f   :  { %p374_p0 = pnand %p373_p13, %p367_p10 }
  0x21   :  { %377 = shalt.err (!%p374_p0)
}
  0x22   :  { %s385_s1 = smov 128   ;;  %s386_s15 = smov 8  }
  0x23   :  { %49 = dma.hbm_to_vmem [thread:$0]  %s456_s3, 1024, %s44_s13, [#allocation6], %s385_s1, %s385_s1, %s386_s15  }
  0x24   :  { %378 = dma.done.wait [#allocation4], 128  }
  0x25   :  { %379 = vsyncadd [#allocation4], 4294967168 }
  0x26   :  { %380 = dma.done.wait [#allocation6], 1152  }
  0x27   :  { %381 = vsyncadd [#allocation6], 4294966144  ;;  %v387_v1 = vmov 0.0   ;;  %vm388_vm0 = vmmov 0   ;;  %vm74_vm1 = vcmask 64512   ;;  %v66_v2 = vld [vmem:[#allocation5] sm:$0xff] }
  0x28   :  { %283 = vmatprep.subr.mxu0 %v387_v1  ;;  %285 = vmatprep.mubr.msk.f32.mxu0 %vm388_vm0, %v387_v1  ;;  %v65_v3 = vld [vmem:[#allocation3] sm:$0xff]  ;;  %v156_v4 = vld [vmem:[#allocation7 + $0x38] sm:$0xff]  ;;  %v154_v6 = vld [vmem:[#allocation7 + $0x28] sm:$0xff]  ;;  %vm164_vm2 = vcmask 523264   ;;  %vm258_vm3 = vcmask 7168  }
  0x29   :  { %288 = vmatprep.subr.mxu1 %v387_v1  ;;  %304 = vmatprep.mubr.msk.f32.mxu1 %vm388_vm0, %v387_v1  ;;  %v155_v5 = vld [vmem:[#allocation7 + $0x30] sm:$0xff]  ;;  %v153_v7 = vld [vmem:[#allocation7 + $0x20] sm:$0xff]  ;;  %v152_v8 = vld [vmem:[#allocation7 + $0x18] sm:$0xff] }
  0x2a   :  { %284 = vmatpush3.msra.mxu0 %v66_v2  ;;  %289 = vmatpush3.msra.mxu1 %v156_v4  ;;  %v151_v9 = vld [vmem:[#allocation7 + $0x10] sm:$0xff]  ;;  %v150_v10 = vld [vmem:[#allocation7 + $0x8] sm:$0xff]  ;;  %v149_v11 = vld [vmem:[#allocation7] sm:$0xff] }
  0x2b   :  { %286 = vmatmul.mubr.msk.f32.vlgmr.msra.gmra.mxu0 %vm74_vm1, %v65_v3  ;;  %290 = vmatprep.subr.mxu1 %v387_v1  ;;  %v266_v12 = vld [vmem:[%s455_s2] ss:$0 sm:$0xff] }
  0x2c   :  { %291 = vmatpush3.msra.mxu1 %v155_v5  ;;  %v268_v17 = vld [vmem:[%s457_s4] ss:$0 sm:$0xff] }
  0x2d   :  { %292 = vmatprep.subr.mxu1 %v387_v1  ;;  %v270_v21 = vld [vmem:[%s458_s5] ss:$0 sm:$0xff] }
  0x2e   :  { %293 = vmatpush3.msra.mxu1 %v154_v6  ;;  %v271_v25 = vld [vmem:[#allocation2] ss:$0 sm:$0xff] }
  0x2f   :  { %294 = vmatprep.subr.mxu1 %v387_v1 }
  0x30   :  { %295 = vmatpush3.msra.mxu1 %v153_v7 }
  0x31   :  { %296 = vmatprep.subr.mxu1 %v387_v1 }
  0x32   :  { %297 = vmatpush3.msra.mxu1 %v152_v8 }
  0x33   :  { %298 = vmatprep.subr.mxu1 %v387_v1 }
  0x34   :  { %299 = vmatpush3.msra.mxu1 %v151_v9 }
  0x35   :  { %300 = vmatprep.subr.mxu1 %v387_v1 }
  0x36   :  { %301 = vmatpush3.msra.mxu1 %v150_v10 }
  0x37   :  { %302 = vmatprep.subr.mxu1 %v387_v1 }
  0x38   :  { %303 = vmatpush3.msra.mxu1 %v149_v11 }
  0xeb   :  { %v144_v13 = vpop.f32.mrf.mxu0 }
  0xec   :  { %v145_v14 = vadd.f32 %v266_v12, %v144_v13 }
  0xed   :  { %v287_v15 = vpop.f32.mrf.mxu0 }
  0xee   :  { %314 = vtanh.f32 %v145_v14 }
  0xfb   :  { %v315_v16 = vpop.eup %314 }
  0xfc   :  { %305 = vmatmul.mubr.msk.f32.vlgmr.msra.gmra.mxu1 %vm164_vm2, %v315_v16 }
 0x1bc   :  { %v234_v18 = vpop.f32.mrf.mxu1 }
 0x1bd   :  { %v235_v19 = vadd.f32 %v268_v17, %v234_v18 }
 0x1be   :  { %v306_v20 = vpop.f32.mrf.mxu1 }
 0x1bf   :  { %316 = vtanh.f32 %v235_v19 }
 0x1cc   :  { %v317_v22 = vpop.eup %316 }
 0x1cd   :  { %v246_v23 = vmul.f32 %v317_v22, %v270_v21 }
 0x1cf   :  { %v247_v24 = vsel %vm164_vm2, %v246_v23, 0.0 }
 0x1d0   :  { %248 = vadd.xlane.f32.xlu0 %v247_v24 }
 0x259   :  { %v249_v26 = vpop.xlane.xlu0 %248 }
 0x25a   :  { %v257_v27 = vadd.f32 %v271_v25, %v249_v26 }
 0x25c   :  { %259 = vst.msk [vmem:[%s460_s7] sm:$0xff] %vm258_vm3, %v257_v27 }
 0x25d   :  { %264 = vsyncpa [#allocation4], 1 }
 0x25e   :  { %265 = vsyncpa [#allocation6], 1 }

</bundles_post_ra>
